<compile_context>
chip_gen: v6e
topology: v6e:2x2x1
jax: 0.10.0
libtpu: 0.0.40
codegen_flags: <defaults>
</compile_context>

<pallas_src>
import functools

import jax
import jax.numpy as jnp
from jax import lax
from jax.experimental import pallas as pl
from jax.experimental.pallas import tpu as pltpu


LANE = 128
SUBLANE = 8


def _round_up(x: int, m: int) -> int:
    return (x + m - 1) // m * m


def _cdiv(a: int, b: int) -> int:
    return (a + b - 1) // b


def _scale_kernel(inv_denom_ref, rewards_ref, task_ids_ref, out_ref,
                  *, num_tasks: int, unroll_max_tasks: int):
    """out = rewards * inv_denom[task_ids].

    rewards/task_ids/out: (tile_rows, C) VMEM tiles (sublane- and lane-dense).
    inv_denom_ref:        (num_tasks,) f32 table resident in SMEM.
    """
    r = rewards_ref[...]          # (tile_rows, C) f32
    tids = task_ids_ref[...]      # (tile_rows, C) i32

    if num_tasks <= unroll_max_tasks:
        # Static unroll: 2 VPU ops per task per vreg, no temporaries.
        inv = jnp.zeros_like(r)
        for t in range(num_tasks):
            inv = jnp.where(tids == t, inv_denom_ref[t], inv)
    else:
        # Large-T fallback: same compare+select, rolled fori_loop with a
        # dynamic scalar SMEM read per task (bounded temporaries, no one-hot).
        def body(t, inv):
            return jnp.where(tids == t, inv_denom_ref[t], inv)
        inv = lax.fori_loop(0, num_tasks, body, jnp.zeros_like(r))

    # Out-of-range task_ids fall through to inv == 0 -> output 0 (padded lanes
    # carry task_id 0 and are sliced off in the wrapper, so padding is safe).
    out_ref[...] = r * inv


def per_task_reward_normalize(rewards, task_ids, g_rms_std, g_r_max,
                              *, g_max: float = 10.0, epsilon: float = 1e-8,
                              max_block_elems: int = 256 * 1024,
                              unroll_max_tasks: int = 64):
    """Pallas implementation of PerTaskRewardNormalizer.forward.

    Args:
      rewards:   [num_envs] float32
      task_ids:  [num_envs] int32
      g_rms_std: [num_tasks, 1] float32  (G_rms._std buffer)
      g_r_max:   [num_tasks] float32     (G_r_max buffer)
    Returns:
      [num_envs] float32 normalized rewards.
    """
    num_envs = int(rewards.shape[0])
    num_tasks = int(g_r_max.shape[0])

    # ---- tiny O(T) prologue: fuse both stat tables into one reciprocal table.
    std1 = g_rms_std.reshape(num_tasks)
    if std1.dtype != jnp.float32:
        std1 = std1.astype(jnp.float32)
    gr1 = g_r_max.reshape(num_tasks)
    if gr1.dtype != jnp.float32:
        gr1 = gr1.astype(jnp.float32)
    denom = jnp.maximum(std1 + epsilon, gr1 / g_max) + epsilon  # exact, as ref
    inv_denom = 1.0 / denom                                     # (T,) f32

    if rewards.dtype != jnp.float32:
        rewards = rewards.astype(jnp.float32)
    if task_ids.dtype != jnp.int32:
        task_ids = task_ids.astype(jnp.int32)

    # ---- layout: 2-D slab (rows, C), C lane-dense, row-tiles sublane-dense.
    if num_envs >= 1024:
        C = 1024
    else:
        C = _round_up(max(num_envs, 1), LANE)
    rows = _cdiv(num_envs, C)
    max_tile_rows = max(SUBLANE, (max_block_elems // C) // SUBLANE * SUBLANE)
    if rows <= max_tile_rows:
        grid_rows = 1
        tile_rows = rows            # single block == full array dims (allowed)
    else:
        grid_rows = _cdiv(rows, max_tile_rows)
        tile_rows = _round_up(_cdiv(rows, grid_rows), SUBLANE)
    rows_total = grid_rows * tile_rows
    e_pad = rows_total * C
    pad = e_pad - num_envs

    if pad:
        r2 = jnp.pad(rewards, (0, pad))
        t2 = jnp.pad(task_ids, (0, pad))   # padded lanes -> task 0 (finite)
    else:
        r2, t2 = rewards, task_ids
    r2 = r2.reshape(rows_total, C)
    t2 = t2.reshape(rows_total, C)

    env_spec = pl.BlockSpec((tile_rows, C), lambda i: (i, 0))

    out = pl.pallas_call(
        functools.partial(_scale_kernel, num_tasks=num_tasks,
                          unroll_max_tasks=unroll_max_tasks),
        out_shape=jax.ShapeDtypeStruct((rows_total, C), jnp.float32),
        grid=(grid_rows,),
        in_specs=[
            pl.BlockSpec(memory_space=pltpu.MemorySpace.SMEM),  # inv_denom table
            env_spec,                                           # rewards
            env_spec,                                           # task_ids
        ],
        out_specs=env_spec,
        compiler_params=pltpu.CompilerParams(
            dimension_semantics=("parallel",)),
    )(inv_denom, r2, t2)

    out = out.reshape(e_pad)
    if pad:
        out = out[:num_envs]
    return out


def _reference(rewards, task_ids, g_rms_std, g_r_max, g_max=10.0, epsilon=1e-8):
    std_for_batch = g_rms_std.reshape(-1)[task_ids]
    g_r_max_for_batch = g_r_max[task_ids]
    var_denominator = std_for_batch + epsilon
    min_required_denominator = g_r_max_for_batch / g_max
    denominator = jnp.maximum(var_denominator, min_required_denominator)
    return rewards / (denominator + epsilon)


if __name__ == "__main__":
    g_max = 10.0
    epsilon = 1e-8
    key = jax.random.PRNGKey(0)

    # ---- case 1: module-scale demo (num_envs=8, num_tasks=4, single tile) ----
    num_tasks = 4
    num_envs = 8
    k_r, k_t, k_std, k_gr, key = jax.random.split(key, 5)
    rewards = jax.random.normal(k_r, (num_envs,), dtype=jnp.float32)
    task_ids = jax.random.randint(k_t, (num_envs,), 0, num_tasks, dtype=jnp.int32)
    g_rms_std = jax.random.uniform(k_std, (num_tasks, 1), dtype=jnp.float32,
                                   minval=0.5, maxval=2.0)
    g_r_max = jax.random.uniform(k_gr, (num_tasks,), dtype=jnp.float32,
                                 minval=0.0, maxval=30.0)

    out = per_task_reward_normalize(rewards, task_ids, g_rms_std, g_r_max,
                                    g_max=g_max, epsilon=epsilon)
    out = jax.block_until_ready(out)
    ref = _reference(rewards, task_ids, g_rms_std, g_r_max, g_max, epsilon)
    assert out.shape == (num_envs,)
    assert jnp.allclose(out, ref, rtol=1e-5, atol=1e-6), (out, ref)

    # ---- case 2: sublane-dense tiled grid (3 blocks of (8, 1024)) ----
    num_envs2 = 20000
    k_r2, k_t2, key = jax.random.split(key, 3)
    rewards2 = jax.random.normal(k_r2, (num_envs2,), dtype=jnp.float32)
    task_ids2 = jax.random.randint(k_t2, (num_envs2,), 0, num_tasks,
                                   dtype=jnp.int32)
    out2 = per_task_reward_normalize(rewards2, task_ids2, g_rms_std, g_r_max,
                                     g_max=g_max, epsilon=epsilon,
                                     max_block_elems=8192)
    out2 = jax.block_until_ready(out2)
    ref2 = _reference(rewards2, task_ids2, g_rms_std, g_r_max, g_max, epsilon)
    assert out2.shape == (num_envs2,)
    assert jnp.allclose(out2, ref2, rtol=1e-5, atol=1e-6), (out2, ref2)

    # ---- case 3: large num_tasks -> rolled (fori_loop) gather path ----
    num_tasks3 = 100
    num_envs3 = 2048
    k_r3, k_t3, k_std3, k_gr3, key = jax.random.split(key, 5)
    rewards3 = jax.random.normal(k_r3, (num_envs3,), dtype=jnp.float32)
    task_ids3 = jax.random.randint(k_t3, (num_envs3,), 0, num_tasks3,
                                   dtype=jnp.int32)
    g_rms_std3 = jax.random.uniform(k_std3, (num_tasks3, 1), dtype=jnp.float32,
                                    minval=0.5, maxval=2.0)
    g_r_max3 = jax.random.uniform(k_gr3, (num_tasks3,), dtype=jnp.float32,
                                  minval=0.0, maxval=30.0)
    out3 = per_task_reward_normalize(rewards3, task_ids3, g_rms_std3, g_r_max3,
                                     g_max=g_max, epsilon=epsilon)
    out3 = jax.block_until_ready(out3)
    ref3 = _reference(rewards3, task_ids3, g_rms_std3, g_r_max3, g_max, epsilon)
    assert out3.shape == (num_envs3,)
    assert jnp.allclose(out3, ref3, rtol=1e-5, atol=1e-6), (out3, ref3)

    print("KERNEL_OK")
</pallas_src>

<mosaic_0001>
module attributes {stable_mosaic.version = 11 : i64} {
  func.func @_scale_kernel(%arg0: i32, %arg1: memref<4xf32, #tpu.memory_space<smem>>, %arg2: memref<1x128xf32, #tpu.memory_space<vmem>>, %arg3: memref<1x128xi32, #tpu.memory_space<vmem>>, %arg4: memref<1x128xf32, #tpu.memory_space<vmem>>) attributes {dimension_semantics = [#tpu.dimension_semantics<parallel>], iteration_bounds = array<i64: 1>, scalar_prefetch = 0 : i64, scratch_operands = 0 : i64, tpu.core_type = #tpu.core_type<tc>, window_params = [{transform_indices = @transform_0, window_bounds = array<i64: 4>}, {transform_indices = @transform_1, window_bounds = array<i64: 1, 128>}, {transform_indices = @transform_2, window_bounds = array<i64: 1, 128>}, {transform_indices = @transform_3, window_bounds = array<i64: 1, 128>}]} {
    %c0 = arith.constant 0 : index
    %c0_0 = arith.constant 0 : index
    %0 = vector.load %arg2[%c0, %c0_0] : memref<1x128xf32, #tpu.memory_space<vmem>>, vector<1x128xf32>
    %c0_1 = arith.constant 0 : index
    %c0_2 = arith.constant 0 : index
    %1 = vector.load %arg3[%c0_1, %c0_2] : memref<1x128xi32, #tpu.memory_space<vmem>>, vector<1x128xi32>
    %cst = arith.constant 0.000000e+00 : f32
    %2 = vector.broadcast %cst : f32 to vector<1x128xf32>
    %c0_i32 = arith.constant 0 : i32
    %3 = vector.broadcast %c0_i32 : i32 to vector<1x128xi32>
    %4 = arith.cmpi eq, %1, %3 : vector<1x128xi32>
    %c0_3 = arith.constant 0 : index
    %5 = memref.load %arg1[%c0_3] : memref<4xf32, #tpu.memory_space<smem>>
    %6 = vector.broadcast %5 : f32 to vector<1x128xf32>
    %7 = arith.select %4, %6, %2 : vector<1x128xi1>, vector<1x128xf32>
    %c1_i32 = arith.constant 1 : i32
    %8 = vector.broadcast %c1_i32 : i32 to vector<1x128xi32>
    %9 = arith.cmpi eq, %1, %8 : vector<1x128xi32>
    %c1 = arith.constant 1 : index
    %10 = memref.load %arg1[%c1] : memref<4xf32, #tpu.memory_space<smem>>
    %11 = vector.broadcast %10 : f32 to vector<1x128xf32>
    %12 = arith.select %9, %11, %7 : vector<1x128xi1>, vector<1x128xf32>
    %c2_i32 = arith.constant 2 : i32
    %13 = vector.broadcast %c2_i32 : i32 to vector<1x128xi32>
    %14 = arith.cmpi eq, %1, %13 : vector<1x128xi32>
    %c2 = arith.constant 2 : index
    %15 = memref.load %arg1[%c2] : memref<4xf32, #tpu.memory_space<smem>>
    %16 = vector.broadcast %15 : f32 to vector<1x128xf32>
    %17 = arith.select %14, %16, %12 : vector<1x128xi1>, vector<1x128xf32>
    %c3_i32 = arith.constant 3 : i32
    %18 = vector.broadcast %c3_i32 : i32 to vector<1x128xi32>
    %19 = arith.cmpi eq, %1, %18 : vector<1x128xi32>
    %c3 = arith.constant 3 : index
    %20 = memref.load %arg1[%c3] : memref<4xf32, #tpu.memory_space<smem>>
    %21 = vector.broadcast %20 : f32 to vector<1x128xf32>
    %22 = arith.select %19, %21, %17 : vector<1x128xi1>, vector<1x128xf32>
    %23 = arith.mulf %0, %22 : vector<1x128xf32>
    %c0_4 = arith.constant 0 : index
    %c0_5 = arith.constant 0 : index
    %24 = vector.load %arg4[%c0_4, %c0_5] : memref<1x128xf32, #tpu.memory_space<vmem>>, vector<1x128xf32>
    tpu.vector_store %arg4[%c0_4, %c0_5], %23 {strides = array<i32>} : memref<1x128xf32, #tpu.memory_space<vmem>>, vector<1x128xf32>,
    return
  }
  func.func @transform_0(%arg0: i32) -> i32 {
    %c0_i32 = arith.constant 0 : i32
    %c0_i32_0 = arith.constant 0 : i32
    return %c0_i32 : i32
  }
  func.func @transform_1(%arg0: i32) -> (i32, i32) {
    %c0_i32 = arith.constant 0 : i32
    %c0_i32_0 = arith.constant 0 : i32
    return %arg0, %c0_i32 : i32, i32
  }
  func.func @transform_2(%arg0: i32) -> (i32, i32) {
    %c0_i32 = arith.constant 0 : i32
    %c0_i32_0 = arith.constant 0 : i32
    return %arg0, %c0_i32 : i32, i32
  }
  func.func @transform_3(%arg0: i32) -> (i32, i32) {
    %c0_i32 = arith.constant 0 : i32
    %c0_i32_0 = arith.constant 0 : i32
    return %arg0, %c0_i32 : i32, i32
  }
}

</mosaic_0001>

<bundles_post_ra>
// kernel: tpu_custom_call.1
= control target key start
LH: loop header
LB: loop body
LE: loop exit
PB: predicated region body
PF: predicated region fallthrough
CT: control target
= control target key end

     0   :  { %8 = vsyncpa [#allocation4], 0  ;;  %s132_s0 = inlined_call_operand.hbm [shape: f32[4], index: 0, kind: input, shape index: {}]   ;;  %s133_s1 = inlined_call_operand.vmem [shape: f32[1,128], index: 1, kind: input, shape index: {}]   ;;  %s134_s2 = inlined_call_operand.vmem [shape: s32[1,128], index: 2, kind: input, shape index: {}]   ;;  %s135_s3 = inlined_call_operand.hbm [shape: f32[1,128], index: 3, kind: output, shape index: {}]  }
   0x1   :  { %9 = vsyncpa [#allocation3], 0  ;;  %s98_s12 = smov [#allocation2]  }
   0x2   :  { %17 = dma.hbm_to_smem %s132_s0, 16, %s98_s12, [#allocation4]  }
   0x3   :  { %94 = dma.done.wait [#allocation4], 16  }
   0x4   :  { %95 = vsyncadd [#allocation4], 4294967280 }
   0x5   :  { %25 = sfence }
   0x6   :  { %s29_s15 = sld [smem:[#allocation2]]  ;;  %v27_v0 = vld [vmem:[%s134_s2] sm:$0x1]  ;;  %s99_s22 = smov [#allocation5]  }
   0x7   :  { %s61_s18 = sld [smem:[#allocation2 + $0x1]]  ;;  %vm28_vm0 = vcmp.eq.s32.totalorder %v27_v0, 0  ;;  %vm32_vm1 = vcmp.eq.s32.totalorder %v27_v0, 1  ;;  %vm36_vm2 = vcmp.eq.s32.totalorder %v27_v0, 2  ;;  %vm40_vm3 = vcmp.eq.s32.totalorder %v27_v0, 3  ;;  %s52_s23 = sshll.u32 %s99_s22, 4  ;;  %s53_s23 = int_to_ptr.vmem [resolvable:$true] %s52_s23 }
   0x8   :  { %s62_s19 = sld [smem:[#allocation2 + $0x2]]  ;;  %v26_v4 = vld [vmem:[%s133_s1] sm:$0x1]  ;;  %s74_s2 = scalar_lea.vmem %s53_s23, 16 }
   0x9   :  { %s63_s20 = sld [smem:[#allocation2 + $0x3]]  ;;  %p75_p0 = scmp.ne.s32.totalorder %s53_s23, %s74_s2 }
   0xa   :  { %s78_s24 = scalar_lea.vmem %s53_s23, 32  ;;  %p79_p1 = scmp.lt.s32.totalorder %s53_s23, %s53_s23 }
   0xb   :  { %p80_p2 = scmp.lt.s32.totalorder %s78_s24, %s74_s2 }
   0xc   :  { %v30_v1 = vstv %s29_s15 }
   0xd   :  { %v31_v2 = vsel %vm28_vm0, %v30_v1, 0.0  ;;  %v34_v3 = vstv %s61_s18  ;;  %p81_p3 = por %p80_p2, %p79_p1 }
   0xe   :  { %v35_v5 = vsel %vm32_vm1, %v34_v3, %v31_v2  ;;  %v38_v6 = vstv %s62_s19 }
   0xf   :  { %v39_v7 = vsel %vm36_vm2, %v38_v6, %v35_v5  ;;  %v42_v8 = vstv %s63_s20  ;;  %p82_p4 = pnand %p81_p3, %p75_p0 }
  0x10   :  { %v43_v9 = vsel %vm40_vm3, %v42_v8, %v39_v7 }
  0x11   :  { %v44_v10 = vmul.f32 %v43_v9, %v26_v4 }
  0x13   :  { %45 = vst [vmem:[#allocation5] sm:$0x1] %v44_v10 }
  0x14   :  { %85 = shalt.err (!%p82_p4)
}
  0x15   :  { %55 = dma.vmem_to_hbm [thread:$0]  %s53_s23, 16, %s135_s3, [#allocation3]  }
  0x16   :  { %96 = dma.done.wait [#allocation3], 16  }
  0x17   :  { %97 = vsyncadd [#allocation3], 4294967280 }
  0x18   :  { %59 = vsyncpa [#allocation3], 1 }
  0x19   :  { %60 = vsyncpa [#allocation4], 1 }

</bundles_post_ra>
